<compile_context>
chip_gen: v6e
topology: v6e:2x2x1
jax: 0.10.0
libtpu: 0.0.40
codegen_flags: <defaults>
</compile_context>

<pallas_src>
import functools

import jax
import jax.numpy as jnp
from jax import lax
from jax.experimental import pallas as pl
from jax.experimental.pallas import tpu as pltpu

_LANE = 128
_SUBLANE = 8
# Per-column-tile VMEM budget for the fused weight. Keeps double-buffered weight
# tiles comfortably inside v7x's smaller 64 MiB VMEM when z_dim grows.
_WEIGHT_TILE_BUDGET_BYTES = 4 * 1024 * 1024


def _round_up(x: int, m: int) -> int:
    return (x + m - 1) // m * m


def _prior_kernel(z_ref, w_ref, b_ref, out_ref, *, zp, tn):
    """Fused dual-head linear:  pre = z @ [W1.T | W2.T] + [b1 | b2].

    Output slab columns [0, zp) are the loc head (identity), [zp, 2*zp) the var
    head (softplus). Padding columns carry zero weights/bias and are sliced off
    (or ignored) by the caller.
    """
    z = z_ref[...]
    w = w_ref[...]
    if w.dtype == jnp.bfloat16:
        # bf16 MXU operands (v6e/v7x fast path); weight already stored bf16 so
        # only the (small) activation is cast per step. Accumulation stays f32.
        z = z.astype(jnp.bfloat16)

    # Single lane-dense MXU matmul covers both heads; f32 accumulate + f32 bias.
    pre = jnp.dot(z, w, preferred_element_type=jnp.float32) + b_ref[...]

    # Branchless, grad-safe softplus: max(x,0) + log1p(exp(-|x|)).
    # Never produces inf/NaN in an untaken branch (safe under jax.grad) and
    # matches PyTorch F.softplus(threshold=20) to within ~2e-9 for x > 20.
    sp = jnp.maximum(pre, 0.0) + jnp.log1p(jnp.exp(-jnp.abs(pre)))

    # Per-column head select: loc head passes through, var head gets softplus.
    col0 = pl.program_id(1) * tn
    col_ids = col0 + lax.broadcasted_iota(jnp.int32, pre.shape, 1)
    out_ref[...] = jnp.where(col_ids >= zp, sp, pre).astype(out_ref.dtype)


def fuse_prior_params(w1, b1, w2, b2, *, weight_dtype=None):
    """One-time parameter prep (hoist OUT of the per-step call path).

    w1, w2: (Z, Z) in PyTorch (out, in) layout; b1, b2: (Z,).
    Returns a lane-dense fused weight (Z, 2*Zp) and f32 bias (1, 2*Zp) with
    Zp = round_up(Z, 128):   [:, :Z] = W1.T / b1,  [:, Zp:Zp+Z] = W2.T / b2.

    weight_dtype=jnp.bfloat16 stores the fused weight in bf16 (v6e/v7x fast
    path: half the weight DMA/VMEM). Bias always stays f32.
    """
    z_dim = w1.shape[0]
    zp = _round_up(z_dim, _LANE)
    wdt = weight_dtype if weight_dtype is not None else w1.dtype
    w = jnp.zeros((z_dim, 2 * zp), dtype=wdt)
    w = w.at[:, :z_dim].set(w1.T.astype(wdt))
    w = w.at[:, zp:zp + z_dim].set(w2.T.astype(wdt))
    b = jnp.zeros((1, 2 * zp), dtype=jnp.float32)
    b = b.at[:, :z_dim].set(b1.astype(jnp.float32))
    b = b.at[:, zp:zp + z_dim].set(b2.astype(jnp.float32))
    return w, b


@functools.partial(jax.jit, static_argnames=("block_b", "block_n", "return_padded"))
def stochastic_prior(z, w_fused, b_fused, *, block_b=2048, block_n=None,
                     return_padded=False):
    """z: (B, Z). w_fused/b_fused from fuse_prior_params.

    Returns (loc, var), each (B, Z); or, if return_padded=True, the raw fused
    slab (B, 2*Zp) — loc = slab[:, :Z], var = slab[:, Zp:Zp+Z] — avoiding the
    two post-call slice copies for bandwidth-sensitive consumers.
    """
    B, Z = z.shape
    two_zp = w_fused.shape[1]
    zp = two_zp // 2

    # --- batch tile --------------------------------------------------------
    if B < 16:
        tm = B                           # full-dim block (legal even if B % 8 != 0)
    else:
        # Keep grid_b >= 2 so the "parallel" batch axis can shard across the
        # 2 TensorCores on v7x (neutral on single-TC v5e/v6e), capped by block_b.
        tm = min(block_b, _round_up(-(-B // 2), _SUBLANE))
    grid_b = -(-B // tm)
    # NOTE: if B % tm != 0, the last grid step reads OOB rows of z. Pallas masks
    # the writes so results stay correct; the garbage rows may hit inf inside
    # exp, which is harmless because they are never stored.

    # --- column tile over the fused loc|var output (multiple of 128) --------
    if block_n is None:
        bytes_per_col = Z * jnp.dtype(w_fused.dtype).itemsize
        max_cols = max(
            _LANE,
            (_WEIGHT_TILE_BUDGET_BYTES // max(1, bytes_per_col)) // _LANE * _LANE,
        )
        tn = min(two_zp, max_cols)
    else:
        tn = min(two_zp, _round_up(block_n, _LANE))
    grid_n = -(-two_zp // tn)

    kernel = functools.partial(_prior_kernel, zp=zp, tn=tn)

    slab = pl.pallas_call(
        kernel,
        out_shape=jax.ShapeDtypeStruct((B, two_zp), z.dtype),
        grid=(grid_b, grid_n),
        in_specs=[
            pl.BlockSpec((tm, Z), lambda i, j: (i, 0)),    # z: batch-tiled, reused across j
            pl.BlockSpec((Z, tn), lambda i, j: (0, j)),    # fused weight column tile
            pl.BlockSpec((1, tn), lambda i, j: (0, j)),    # fused bias column tile (f32)
        ],
        # Single lane-dense fused output slab -> one output DMA stream per step.
        out_specs=pl.BlockSpec((tm, tn), lambda i, j: (i, j)),
        compiler_params=pltpu.CompilerParams(
            dimension_semantics=("parallel", "parallel"),
            vmem_limit_bytes=32 * 1024 * 1024,
        ),
    )(z, w_fused, b_fused)

    if return_padded:
        return slab
    # Padding columns of the var head contain softplus(0)=ln(2); they are
    # discarded here (consumers of the padded slab must also ignore them).
    return slab[:, :Z], slab[:, zp:zp + Z]


def _ref_forward(z, w1, b1, w2, b2):
    loc = z @ w1.T + b1
    pre = z @ w2.T + b2
    var = jnp.where(pre > 20.0, pre, jnp.log1p(jnp.exp(jnp.minimum(pre, 20.0))))
    return loc, var


if __name__ == "__main__":
    key = jax.random.PRNGKey(0)
    B, Z = 8, 32  # batch, z_dim (toy deployed shape)

    k_z, k_w1, k_b1, k_w2, k_b2, k_zb = jax.random.split(key, 6)
    bound = 1.0 / (Z ** 0.5)
    z = jax.random.normal(k_z, (B, Z), dtype=jnp.float32)
    w1 = jax.random.uniform(k_w1, (Z, Z), minval=-bound, maxval=bound, dtype=jnp.float32)
    b1 = jax.random.uniform(k_b1, (Z,), minval=-bound, maxval=bound, dtype=jnp.float32)
    w2 = jax.random.uniform(k_w2, (Z, Z), minval=-bound, maxval=bound, dtype=jnp.float32)
    b2 = jax.random.uniform(k_b2, (Z,), minval=-bound, maxval=bound, dtype=jnp.float32)

    # One-time parameter fusion (not part of the per-call hot path).
    w_f32, b_f32 = fuse_prior_params(w1, b1, w2, b2)
    w_bf16, b_bf16 = fuse_prior_params(w1, b1, w2, b2, weight_dtype=jnp.bfloat16)

    loc_ref, var_ref = _ref_forward(z, w1, b1, w2, b2)

    # --- f32 weight path (bit-faithful to the reference) --------------------
    loc, var = stochastic_prior(z, w_f32, b_f32)
    jax.block_until_ready((loc, var))
    assert loc.shape == (B, Z) and var.shape == (B, Z)
    assert jnp.allclose(loc, loc_ref, atol=1e-5, rtol=1e-5), "loc mismatch"
    assert jnp.allclose(var, var_ref, atol=1e-5, rtol=1e-5), "var mismatch"
    assert bool(jnp.all(var > 0)), "variance must be positive"

    # Padded-slab path (no post-call slice copies) is consistent with the sliced view.
    slab = stochastic_prior(z, w_f32, b_f32, return_padded=True)
    jax.block_until_ready(slab)
    zp = w_f32.shape[1] // 2
    assert jnp.allclose(slab[:, :Z], loc) and jnp.allclose(slab[:, zp:zp + Z], var)

    # --- bf16 weight-storage path (v6e/v7x fast path), looser tolerance -----
    loc_bf, var_bf = stochastic_prior(z, w_bf16, b_bf16)
    jax.block_until_ready((loc_bf, var_bf))
    assert jnp.allclose(loc_bf, loc_ref, atol=5e-2, rtol=5e-2), "bf16 loc mismatch"
    assert jnp.allclose(var_bf, var_ref, atol=5e-2, rtol=5e-2), "bf16 var mismatch"

    # --- larger batch: exercises grid_b >= 2 (v7x 2-TC split) + column tiling
    Bb = 64
    zb = jax.random.normal(k_zb, (Bb, Z), dtype=jnp.float32)
    loc_b_ref, var_b_ref = _ref_forward(zb, w1, b1, w2, b2)
    loc_b, var_b = stochastic_prior(zb, w_f32, b_f32, block_n=128)
    jax.block_until_ready((loc_b, var_b))
    assert jnp.allclose(loc_b, loc_b_ref, atol=1e-5, rtol=1e-5), "tiled loc mismatch"
    assert jnp.allclose(var_b, var_b_ref, atol=1e-5, rtol=1e-5), "tiled var mismatch"

    print("KERNEL_OK")
</pallas_src>

<mosaic_0001>
module attributes {stable_mosaic.version = 11 : i64} {
  func.func @_prior_kernel(%arg0: i32, %arg1: i32, %arg2: memref<8x32xf32, #tpu.memory_space<vmem>>, %arg3: memref<32x256xf32, #tpu.memory_space<vmem>>, %arg4: memref<1x256xf32, #tpu.memory_space<vmem>>, %arg5: memref<8x256xf32, #tpu.memory_space<vmem>>) attributes {dimension_semantics = [#tpu.dimension_semantics<parallel>, #tpu.dimension_semantics<parallel>], iteration_bounds = array<i64: 1, 1>, scalar_prefetch = 0 : i64, scratch_operands = 0 : i64, tpu.core_type = #tpu.core_type<tc>, window_params = [{transform_indices = @transform_0, window_bounds = array<i64: 8, 32>}, {transform_indices = @transform_1, window_bounds = array<i64: 32, 256>}, {transform_indices = @transform_2, window_bounds = array<i64: 1, 256>}, {transform_indices = @transform_3, window_bounds = array<i64: 8, 256>}]} {
    %c0 = arith.constant 0 : index
    %c0_0 = arith.constant 0 : index
    %0 = vector.load %arg2[%c0, %c0_0] : memref<8x32xf32, #tpu.memory_space<vmem>>, vector<8x32xf32>
    %c0_1 = arith.constant 0 : index
    %c0_2 = arith.constant 0 : index
    %1 = vector.load %arg3[%c0_1, %c0_2] : memref<32x256xf32, #tpu.memory_space<vmem>>, vector<32x256xf32>
    %cst = arith.constant dense<0.000000e+00> : vector<8x256xf32>
    %2 = tpu.matmul %0, %1, %cst {dimension_numbers = #tpu.dot_dimension_numbers<[1], [0], [0], [1], [0, 0, 1, 1], [], []>} : vector<8x32xf32>, vector<32x256xf32>, vector<8x256xf32> -> vector<8x256xf32>
    %c0_3 = arith.constant 0 : index
    %c0_4 = arith.constant 0 : index
    %3 = vector.load %arg4[%c0_3, %c0_4] : memref<1x256xf32, #tpu.memory_space<vmem>>, vector<1x256xf32>
    %4 = vector.broadcast %3 : vector<1x256xf32> to vector<8x256xf32>
    %5 = arith.addf %2, %4 : vector<8x256xf32>
    %cst_5 = arith.constant 0.000000e+00 : f32
    %6 = vector.broadcast %cst_5 : f32 to vector<8x256xf32>
    %7 = arith.maximumf %5, %6 : vector<8x256xf32>
    %8 = math.absf %5 : vector<8x256xf32>
    %cst_6 = arith.constant 0.000000e+00 : f32
    %9 = vector.broadcast %cst_6 : f32 to vector<8x256xf32>
    %10 = arith.subf %9, %8 : vector<8x256xf32>
    %11 = math.exp %10 : vector<8x256xf32>
    %12 = math.log1p %11 : vector<8x256xf32>
    %13 = arith.addf %7, %12 : vector<8x256xf32>
    %c256_i32 = arith.constant 256 : i32
    %14 = arith.muli %arg1, %c256_i32 : i32
    %15 = tpu.iota {dimensions = array<i32: 1>} : vector<8x256xi32>
    %16 = vector.broadcast %14 : i32 to vector<8x256xi32>
    %17 = arith.addi %16, %15 : vector<8x256xi32>
    %c128_i32 = arith.constant 128 : i32
    %18 = vector.broadcast %c128_i32 : i32 to vector<8x256xi32>
    %19 = arith.cmpi sge, %17, %18 : vector<8x256xi32>
    %20 = arith.select %19, %13, %5 : vector<8x256xi1>, vector<8x256xf32>
    %c0_7 = arith.constant 0 : index
    %c0_8 = arith.constant 0 : index
    %21 = vector.load %arg5[%c0_7, %c0_8] : memref<8x256xf32, #tpu.memory_space<vmem>>, vector<8x256xf32>
    tpu.vector_store %arg5[%c0_7, %c0_8], %20 {strides = array<i32>} : memref<8x256xf32, #tpu.memory_space<vmem>>, vector<8x256xf32>,
    return
  }
  func.func @transform_0(%arg0: i32, %arg1: i32) -> (i32, i32) {
    %c0_i32 = arith.constant 0 : i32
    %c0_i32_0 = arith.constant 0 : i32
    return %arg0, %c0_i32 : i32, i32
  }
  func.func @transform_1(%arg0: i32, %arg1: i32) -> (i32, i32) {
    %c0_i32 = arith.constant 0 : i32
    %c0_i32_0 = arith.constant 0 : i32
    return %c0_i32, %arg1 : i32, i32
  }
  func.func @transform_2(%arg0: i32, %arg1: i32) -> (i32, i32) {
    %c0_i32 = arith.constant 0 : i32
    %c0_i32_0 = arith.constant 0 : i32
    return %c0_i32, %arg1 : i32, i32
  }
  func.func @transform_3(%arg0: i32, %arg1: i32) -> (i32, i32) {
    %c0_i32 = arith.constant 0 : i32
    return %arg0, %arg1 : i32, i32
  }
}

</mosaic_0001>

<bundles_post_ra>
// kernel: stochastic_prior.1
= control target key start
LH: loop header
LB: loop body
LE: loop exit
PB: predicated region body
PF: predicated region fallthrough
CT: control target
= control target key end

     0   :  { %8 = vsyncpa [#allocation3], 0  ;;  %s279_s0 = inlined_call_operand.hbm [shape: f32[8,32], index: 0, kind: input, shape index: {}]   ;;  %s280_s1 = inlined_call_operand.hbm [shape: f32[32,256], index: 1, kind: input, shape index: {}]   ;;  %s281_s2 = inlined_call_operand.vmem [shape: f32[1,256], index: 2, kind: input, shape index: {}]   ;;  %s282_s3 = inlined_call_operand.vmem [shape: f32[8,256], index: 3, kind: output, shape index: {}]  }
   0x1   :  { %9 = vsyncpa [#allocation5], 0  ;;  %s239_s12 = smov [#allocation2]   ;;  %s240_s14 = smov [#allocation4]  }
   0x2   :  { %s16_s13 = sshll.u32 %s239_s12, 4  ;;  %s25_s15 = sshll.u32 %s240_s14, 4  ;;  %s17_s13 = int_to_ptr.vmem [resolvable:$true] %s16_s13  ;;  %s26_s15 = int_to_ptr.vmem [resolvable:$true] %s25_s15 }
   0x3   :  { %s203_s16 = scalar_lea.vmem %s17_s13, 128  ;;  %p208_p1 = scmp.lt.s32.totalorder %s17_s13, %s17_s13 }
   0x4   :  { %p204_p0 = scmp.ne.s32.totalorder %s17_s13, %s203_s16  ;;  %p209_p2 = scmp.lt.s32.totalorder %s203_s16, %s203_s16 }
   0x6   :  { %p210_p3 = por %p209_p2, %p208_p1 }
   0x8   :  { %p211_p4 = pnand %p210_p3, %p204_p0 }
   0xa   :  { %214 = shalt.err (!%p211_p4)
}
   0xb   :  { %19 = dma.hbm_to_vmem [thread:$0]  %s279_s0, 128, %s17_s13, [#allocation3]  }
   0xc   :  { %s223_s19 = scalar_lea.vmem %s26_s15, 1024  ;;  %p228_p6 = scmp.lt.s32.totalorder %s26_s15, %s26_s15 }
   0xd   :  { %p224_p5 = scmp.ne.s32.totalorder %s26_s15, %s223_s19  ;;  %p229_p7 = scmp.lt.s32.totalorder %s223_s19, %s223_s19 }
   0xf   :  { %p230_p8 = por %p229_p7, %p228_p6 }
  0x11   :  { %p231_p9 = pnand %p230_p8, %p224_p5 }
  0x13   :  { %234 = shalt.err (!%p231_p9)
}
  0x14   :  { %s241_s20 = smov 256   ;;  %s242_s21 = smov 16  }
  0x15   :  { %31 = dma.hbm_to_vmem [thread:$0]  %s280_s1, 1024, %s26_s15, [#allocation5], %s241_s20, %s241_s20, %s242_s21  }
  0x16   :  { %235 = dma.done.wait [#allocation3], 128  }
  0x17   :  { %236 = vsyncadd [#allocation3], 4294967168 }
  0x18   :  { %237 = dma.done.wait [#allocation5], 1024  }
  0x19   :  { %238 = vsyncadd [#allocation5], 4294966272  ;;  %v243_v0 = vmov 0.0   ;;  %v48_v1 = vld [vmem:[#allocation4 + $0x38] sm:$0xff]  ;;  %v47_v2 = vld [vmem:[#allocation4 + $0x30] sm:$0xff]  ;;  %vm61_vm0 = vcmask 261120   ;;  %v51_v10 = vlaneseq }
  0x1a   :  { %129 = vmatprep.mubr.f32.mxu0 %v243_v0  ;;  %v46_v3 = vld [vmem:[#allocation4 + $0x28] sm:$0xff]  ;;  %89 = vmatprep.subr.mxu0 %v48_v1  ;;  %v45_v4 = vld [vmem:[#allocation4 + $0x20] sm:$0xff]  ;;  %v44_v5 = vld [vmem:[#allocation4 + $0x18] sm:$0xff] }
  0x1b   :  { %90 = vmatpush1.msra.mxu0 %v47_v2  ;;  %v43_v6 = vld [vmem:[#allocation4 + $0x10] sm:$0xff]  ;;  %v42_v7 = vld [vmem:[#allocation4 + $0x8] sm:$0xff]  ;;  %v41_v8 = vld [vmem:[#allocation4] sm:$0xff]  ;;  %v52_v11 = vshrl.u32 %v51_v10, 7 }
  0x1c   :  { %91 = vmatprep.subr.mxu0 %v46_v3  ;;  %v40_v9 = vld [vmem:[#allocation2] sm:$0xff] }
  0x1d   :  { %92 = vmatpush1.msra.mxu0 %v45_v4  ;;  %v53_v12 = vsub.s32 0, %v52_v11  ;;  %v49_v13 = vld [vmem:[%s281_s2] sm:$0x3]  ;;  %v57_v14 = vsub.s32 1, %v52_v11 }
  0x1e   :  { %93 = vmatprep.subr.mxu0 %v44_v5 }
  0x1f   :  { %94 = vmatpush1.msra.mxu0 %v43_v6  ;;  %v54_v15 = vrot.slane %v49_v13, %v53_v12  ;;  %v58_v16 = vrot.slane %v49_v13, %v57_v14 }
  0x20   :  { %95 = vmatprep.subr.mxu0 %v42_v7 }
  0x21   :  { %96 = vmatpush1.msra.mxu0 %v41_v8 }
  0x22   :  { %185 = vmatmul.mubr.msk.f32.vlgmr.msra.gmra.mxu0 %vm61_vm0, %v40_v9 }
  0xe2   :  { %v131_v17 = vpop.f32.mrf.mxu0 }
  0xe3   :  { %v132_v18 = vadd.f32 %v131_v17, %v54_v15 }
  0xe4   :  { %v133_v19 = vpop.f32.mrf.mxu0 }
  0xe5   :  { %177 = vst [vmem:[%s282_s3] sm:$0xff] %v132_v18  ;;  %v134_v20 = vadd.f32 %v133_v19, %v58_v16 }
  0xe7   :  { %v139_v21 = vand.u32 2147483647, %v134_v20  ;;  %v137_v32 = vmax.f32 %v134_v20, 0.0 }
  0xe9   :  { %v141_v22 = vsub.f32 0.0, %v139_v21 }
  0xeb   :  { %v144_v23 = vmul.f32 1.442695, %v141_v22 }
  0xed   :  { %191 = vpow2.f32 %v144_v23 }
  0xfa   :  { %v192_v24 = vpop.eup %191 }
  0xfb   :  { %v155_v25 = vadd.f32 1.0, %v192_v24  ;;  %v158_v26 = vmul.f32 -0.5, %v192_v24  ;;  %v161_v28 = vand.u32 2147483647, %v192_v24 }
  0xfd   :  { %193 = vlog2.f32 %v155_v25  ;;  %v159_v27 = vadd.f32 1.0, %v158_v26  ;;  %vm162_vm1 = vcmp.lt.f32.partialorder %v161_v28, 0.0004427343 }
  0xff   :  { %v160_v31 = vmul.f32 %v192_v24, %v159_v27 }
 0x10a   :  { %v194_v29 = vpop.eup %193 }
 0x10b   :  { %v157_v30 = vmul.f32 0.6931472, %v194_v29 }
 0x10d   :  { %v163_v33 = vsel %vm162_vm1, %v160_v31, %v157_v30 }
 0x10e   :  { %v165_v34 = vadd.f32 %v163_v33, %v137_v32 }
 0x110   :  { %178 = vst [vmem:[%s282_s3 + $0x8] sm:$0xff] %v165_v34 }
 0x111   :  { %183 = vsyncpa [#allocation3], 1 }
 0x112   :  { %184 = vsyncpa [#allocation5], 1 }

</bundles_post_ra>
